<compile_context>
chip_gen: v7x
topology: tpu7x:2x2x1
jax: 0.10.0
libtpu: 0.0.40
codegen_flags: <defaults>
</compile_context>

<pallas_src>
import functools

import jax
import jax.numpy as jnp
from jax import lax
from jax.experimental import pallas as pl
from jax.experimental.pallas import tpu as pltpu


# ----------------------------------------------------------------------------
# Portable counter-based PRNG (murmur3 fmix32 on int32 lanes).
# ----------------------------------------------------------------------------
def _shr_logical(x, k):
    # Logical right shift for int32 = arithmetic shift + mask of the high bits.
    return (x >> k) & jnp.int32((1 << (32 - k)) - 1)


def _fmix32(x):
    x = x ^ _shr_logical(x, 16)
    x = x * jnp.int32(-2048144789)     # 0x85EBCA6B (two's complement)
    x = x ^ _shr_logical(x, 13)
    x = x * jnp.int32(-1028477387)     # 0xC2B2AE35 (two's complement)
    x = x ^ _shr_logical(x, 16)
    return x


def _keep_mask(seed_i32, row0_i32, shape, layer_salt, threshold31):
    """Deterministic per-element keep mask; invariant to the batch tiling."""
    rows = lax.broadcasted_iota(jnp.int32, shape, 0) + row0_i32
    cols = lax.broadcasted_iota(jnp.int32, shape, 1)
    gidx = rows * jnp.int32(shape[1]) + cols
    x = gidx * jnp.int32(-1640531527)            # 0x9E3779B9 (golden ratio, odd)
    x = x + seed_i32 * jnp.int32(1013904223)
    x = x + jnp.int32(layer_salt * 374761393)
    r = _fmix32(x) & jnp.int32(0x7FFFFFFF)       # uniform in [0, 2^31)
    return r >= jnp.int32(threshold31)           # keep with prob ~ (1 - p)


def _prelu(x, a):
    return jnp.where(x > 0, x, a * x)


# ----------------------------------------------------------------------------
# Kernel
# ----------------------------------------------------------------------------
def mcd_mlp_kernel(seed_ref, a_ref, b3_ref,                 # SMEM scalars
                   x_ref, w1_ref, b1_ref, w2_ref, b2_ref, w3_ref,  # VMEM
                   out_ref,
                   *, tile_rows, threshold31, compute_dtype):
    seed = seed_ref[0]
    a_hidden = a_ref[0]          # shared PReLU param (same nn.PReLU instance reused)
    a_final = a_ref[1]           # final PReLU param
    b3 = b3_ref[0]
    row0 = pl.program_id(0) * tile_rows   # global batch offset of this tile

    x = x_ref[...]               # (TB, 156), already in compute dtype

    # Layer 1: Linear(156 -> 128) + PReLU + MC-dropout (select only; scale folded).
    h = jnp.dot(x, w1_ref[...], preferred_element_type=jnp.float32) + b1_ref[...]
    h = _prelu(h, a_hidden)
    h = jnp.where(_keep_mask(seed, row0, h.shape, 1, threshold31), h, 0.0)

    # Layer 2: Linear(128 -> 128) + PReLU + MC-dropout.
    h = jnp.dot(h.astype(compute_dtype), w2_ref[...],
                preferred_element_type=jnp.float32) + b2_ref[...]
    h = _prelu(h, a_hidden)
    h = jnp.where(_keep_mask(seed, row0, h.shape, 2, threshold31), h, 0.0)

    # Head: Linear(128 -> 1), computed as (1,128) @ (TB,128)^T so the result is
    # lane-dense (1, TB) and the output store is unmasked / full-lane.
    y = lax.dot_general(w3_ref[...], h.astype(compute_dtype),
                        (((1,), (1,)), ((), ())),
                        preferred_element_type=jnp.float32)
    y = _prelu(y + b3, a_final)
    out_ref[...] = y.astype(out_ref.dtype)


# ----------------------------------------------------------------------------
# Wrapper
# ----------------------------------------------------------------------------
def _round_up(x, m):
    return (x + m - 1) // m * m


def aimeetsai_mcd_forward(features, params, seed, *, p_drop=0.1,
                          block_b=1024, use_bf16=True):
    """Full MLP forward as one Pallas call, gridded over the batch."""
    w1, b1, w2, b2, w3, b3, a_params = params
    B, d_in = features.shape
    h1 = w1.shape[1]
    h2 = w2.shape[1]

    compute_dtype = jnp.bfloat16 if use_bf16 else jnp.float32

    # Fold the inverted-dropout rescale 1/(1-p) into the *following* weights.
    inv_keep = 1.0 / (1.0 - p_drop)
    w1_c = w1.astype(compute_dtype)
    w2_c = (w2 * inv_keep).astype(compute_dtype)
    w3_row = (w3 * inv_keep).reshape(1, h2).astype(compute_dtype)
    b1_f = b1.reshape(1, h1).astype(jnp.float32)
    b2_f = b2.reshape(1, h2).astype(jnp.float32)
    b3_f = b3.reshape(1).astype(jnp.float32)
    a_f = a_params.reshape(2).astype(jnp.float32)

    # Batch tiling: pad B so every block is full.
    b_pad8 = _round_up(B, 8)
    if b_pad8 <= block_b:
        tb = b_pad8
        b_pad = b_pad8
    else:
        assert block_b % 128 == 0, "block_b must be a multiple of 128"
        tb = block_b
        b_pad = _round_up(B, tb)

    x = features.astype(compute_dtype)
    if b_pad != B:
        x = jnp.pad(x, ((0, b_pad - B), (0, 0)))

    n_tiles = b_pad // tb
    threshold31 = min(int(p_drop * float(1 << 31)), (1 << 31) - 1)
    seed_arr = jnp.asarray([seed], dtype=jnp.int32)

    smem = pl.BlockSpec(memory_space=pltpu.MemorySpace.SMEM)
    out = pl.pallas_call(
        functools.partial(mcd_mlp_kernel, tile_rows=tb,
                          threshold31=threshold31, compute_dtype=compute_dtype),
        grid=(n_tiles,),
        in_specs=[
            smem,                                              # seed (1,) int32
            smem,                                              # prelu params (2,)
            smem,                                              # final bias (1,)
            pl.BlockSpec((tb, d_in), lambda i: (i, 0)),        # activations stream
            pl.BlockSpec((d_in, h1), lambda i: (0, 0)),        # w1 (VMEM-resident)
            pl.BlockSpec((1, h1), lambda i: (0, 0)),           # b1
            pl.BlockSpec((h1, h2), lambda i: (0, 0)),          # w2 (pre-scaled)
            pl.BlockSpec((1, h2), lambda i: (0, 0)),           # b2
            pl.BlockSpec((1, h2), lambda i: (0, 0)),           # w3 row (pre-scaled)
        ],
        out_specs=pl.BlockSpec((1, tb), lambda i: (0, i)),     # lane-dense output
        out_shape=jax.ShapeDtypeStruct((1, b_pad), jnp.float32),
        compiler_params=pltpu.CompilerParams(
            dimension_semantics=("parallel",)),
    )(seed_arr, a_f, b3_f, x, w1_c, b1_f, w2_c, b2_f, w3_row)

    return {'output': out[0, :B].reshape(B, 1)}


# ----------------------------------------------------------------------------
# Pure-JAX reference (same masks / same preprocessing) and parameter init
# ----------------------------------------------------------------------------
def reference_forward(features, params, seed, *, p_drop=0.1, use_bf16=True):
    w1, b1, w2, b2, w3, b3, a_params = params
    B, _ = features.shape
    h1 = w1.shape[1]
    h2 = w2.shape[1]
    cd = jnp.bfloat16 if use_bf16 else jnp.float32
    inv_keep = 1.0 / (1.0 - p_drop)
    threshold31 = min(int(p_drop * float(1 << 31)), (1 << 31) - 1)
    seed_i = jnp.int32(seed)
    a_hidden = a_params.reshape(2)[0]
    a_final = a_params.reshape(2)[1]

    x = features.astype(cd)
    h = jnp.dot(x, w1.astype(cd), preferred_element_type=jnp.float32) + b1.reshape(1, h1)
    h = _prelu(h, a_hidden)
    h = jnp.where(_keep_mask(seed_i, jnp.int32(0), h.shape, 1, threshold31), h, 0.0)

    h = jnp.dot(h.astype(cd), (w2 * inv_keep).astype(cd),
                preferred_element_type=jnp.float32) + b2.reshape(1, h2)
    h = _prelu(h, a_hidden)
    h = jnp.where(_keep_mask(seed_i, jnp.int32(0), h.shape, 2, threshold31), h, 0.0)

    w3_row = (w3 * inv_keep).reshape(1, h2).astype(cd)
    y = lax.dot_general(w3_row, h.astype(cd), (((1,), (1,)), ((), ())),
                        preferred_element_type=jnp.float32)
    y = _prelu(y + b3.reshape(1)[0], a_final)
    return y.reshape(B, 1)


def init_params(key, input_dims=156, hidden_dims=(128, 128)):
    """Mirrors nn.Linear's U(-1/sqrt(fan_in), 1/sqrt(fan_in)) init."""
    dims = [input_dims] + list(hidden_dims) + [1]
    params = []
    for i in range(len(dims) - 1):
        key, kw, kb = jax.random.split(key, 3)
        bound = 1.0 / (dims[i] ** 0.5)
        w = jax.random.uniform(kw, (dims[i], dims[i + 1]), jnp.float32, -bound, bound)
        b = jax.random.uniform(kb, (1, dims[i + 1]), jnp.float32, -bound, bound)
        params += [w, b]
    # PReLU params: [shared hidden activation, final activation], both init 0.25.
    params.append(jnp.array([0.25, 0.25], dtype=jnp.float32))
    return tuple(params)


if __name__ == "__main__":
    key = jax.random.PRNGKey(0)
    k_feat1, k_feat2, k_param = jax.random.split(key, 3)

    INPUT_DIMS = 156   # module defaults: input_dims=156, hidden_dims=[128,128]
    params = init_params(k_param, input_dims=INPUT_DIMS, hidden_dims=(128, 128))

    # Small batch (single tile).
    B1 = 64
    feats1 = jax.random.normal(k_feat1, (B1, INPUT_DIMS), dtype=jnp.float32)
    out1 = jax.block_until_ready(
        aimeetsai_mcd_forward(feats1, params, seed=1234, p_drop=0.1)['output'])
    ref1 = reference_forward(feats1, params, seed=1234, p_drop=0.1)
    assert out1.shape == (B1, 1), out1.shape
    assert bool(jnp.all(jnp.isfinite(out1)))
    assert bool(jnp.allclose(out1, ref1, rtol=2e-2, atol=2e-2))

    # Larger batch exercising the batch grid (3 tiles of 128 rows, with padding).
    B2 = 300
    feats2 = jax.random.normal(k_feat2, (B2, INPUT_DIMS), dtype=jnp.float32)
    out2 = jax.block_until_ready(
        aimeetsai_mcd_forward(feats2, params, seed=7, p_drop=0.1,
                              block_b=128)['output'])
    ref2 = reference_forward(feats2, params, seed=7, p_drop=0.1)
    assert out2.shape == (B2, 1), out2.shape
    assert bool(jnp.all(jnp.isfinite(out2)))
    assert bool(jnp.allclose(out2, ref2, rtol=2e-2, atol=2e-2))

    print("KERNEL_OK")
</pallas_src>

<mosaic_0001>
module attributes {stable_mosaic.version = 11 : i64} {
  func.func @mcd_mlp_kernel(%arg0: i32, %arg1: memref<1xi32, #tpu.memory_space<smem>>, %arg2: memref<2xf32, #tpu.memory_space<smem>>, %arg3: memref<1xf32, #tpu.memory_space<smem>>, %arg4: memref<64x156xbf16, #tpu.memory_space<vmem>>, %arg5: memref<156x128xbf16, #tpu.memory_space<vmem>>, %arg6: memref<1x128xf32, #tpu.memory_space<vmem>>, %arg7: memref<128x128xbf16, #tpu.memory_space<vmem>>, %arg8: memref<1x128xf32, #tpu.memory_space<vmem>>, %arg9: memref<1x128xbf16, #tpu.memory_space<vmem>>, %arg10: memref<1x64xf32, #tpu.memory_space<vmem>>) attributes {dimension_semantics = [#tpu.dimension_semantics<parallel>], iteration_bounds = array<i64: 1>, scalar_prefetch = 0 : i64, scratch_operands = 0 : i64, tpu.core_type = #tpu.core_type<tc>, window_params = [{transform_indices = @transform_0, window_bounds = array<i64: 1>}, {transform_indices = @transform_1, window_bounds = array<i64: 2>}, {transform_indices = @transform_2, window_bounds = array<i64: 1>}, {transform_indices = @transform_3, window_bounds = array<i64: 64, 156>}, {pipeline_mode = #tpu.pipeline_mode<synchronous>, transform_indices = @transform_4, window_bounds = array<i64: 156, 128>}, {pipeline_mode = #tpu.pipeline_mode<synchronous>, transform_indices = @transform_5, window_bounds = array<i64: 1, 128>}, {pipeline_mode = #tpu.pipeline_mode<synchronous>, transform_indices = @transform_6, window_bounds = array<i64: 128, 128>}, {pipeline_mode = #tpu.pipeline_mode<synchronous>, transform_indices = @transform_7, window_bounds = array<i64: 1, 128>}, {pipeline_mode = #tpu.pipeline_mode<synchronous>, transform_indices = @transform_8, window_bounds = array<i64: 1, 128>}, {transform_indices = @transform_9, window_bounds = array<i64: 1, 64>}]} {
    %c0 = arith.constant 0 : index
    %0 = memref.load %arg1[%c0] : memref<1xi32, #tpu.memory_space<smem>>
    %c0_0 = arith.constant 0 : index
    %1 = memref.load %arg2[%c0_0] : memref<2xf32, #tpu.memory_space<smem>>
    %c1 = arith.constant 1 : index
    %2 = memref.load %arg2[%c1] : memref<2xf32, #tpu.memory_space<smem>>
    %c0_1 = arith.constant 0 : index
    %3 = memref.load %arg3[%c0_1] : memref<1xf32, #tpu.memory_space<smem>>
    %c64_i32 = arith.constant 64 : i32
    %4 = arith.muli %arg0, %c64_i32 : i32
    %c0_2 = arith.constant 0 : index
    %c0_3 = arith.constant 0 : index
    %5 = vector.load %arg4[%c0_2, %c0_3] : memref<64x156xbf16, #tpu.memory_space<vmem>>, vector<64x156xbf16>
    %c0_4 = arith.constant 0 : index
    %c0_5 = arith.constant 0 : index
    %6 = vector.load %arg5[%c0_4, %c0_5] : memref<156x128xbf16, #tpu.memory_space<vmem>>, vector<156x128xbf16>
    %cst = arith.constant dense<0.000000e+00> : vector<64x128xf32>
    %7 = tpu.matmul %5, %6, %cst {dimension_numbers = #tpu.dot_dimension_numbers<[1], [0], [0], [1], [0, 0, 1, 1], [], []>} : vector<64x156xbf16>, vector<156x128xbf16>, vector<64x128xf32> -> vector<64x128xf32>
    %c0_6 = arith.constant 0 : index
    %c0_7 = arith.constant 0 : index
    %8 = vector.load %arg6[%c0_6, %c0_7] : memref<1x128xf32, #tpu.memory_space<vmem>>, vector<1x128xf32>
    %9 = vector.broadcast %8 : vector<1x128xf32> to vector<64x128xf32>
    %10 = arith.addf %7, %9 : vector<64x128xf32>
    %cst_8 = arith.constant 0.000000e+00 : f32
    %11 = vector.broadcast %cst_8 : f32 to vector<64x128xf32>
    %12 = arith.cmpf ogt, %10, %11 : vector<64x128xf32>
    %13 = vector.broadcast %1 : f32 to vector<64x128xf32>
    %14 = arith.mulf %13, %10 : vector<64x128xf32>
    %15 = arith.select %12, %10, %14 : vector<64x128xi1>, vector<64x128xf32>
    %16 = tpu.iota {dimensions = array<i32: 0>} : vector<64x128xi32>
    %17 = vector.broadcast %4 : i32 to vector<64x128xi32>
    %18 = arith.addi %16, %17 : vector<64x128xi32>
    %19 = tpu.iota {dimensions = array<i32: 1>} : vector<64x128xi32>
    %c128_i32 = arith.constant 128 : i32
    %20 = vector.broadcast %c128_i32 : i32 to vector<64x128xi32>
    %21 = arith.muli %18, %20 : vector<64x128xi32>
    %22 = arith.addi %21, %19 : vector<64x128xi32>
    %c-1640531527_i32 = arith.constant -1640531527 : i32
    %23 = vector.broadcast %c-1640531527_i32 : i32 to vector<64x128xi32>
    %24 = arith.muli %22, %23 : vector<64x128xi32>
    %c1013904223_i32 = arith.constant 1013904223 : i32
    %25 = arith.muli %0, %c1013904223_i32 : i32
    %26 = vector.broadcast %25 : i32 to vector<64x128xi32>
    %27 = arith.addi %24, %26 : vector<64x128xi32>
    %c374761393_i32 = arith.constant 374761393 : i32
    %28 = vector.broadcast %c374761393_i32 : i32 to vector<64x128xi32>
    %29 = arith.addi %27, %28 : vector<64x128xi32>
    %c16_i32 = arith.constant 16 : i32
    %30 = vector.broadcast %c16_i32 : i32 to vector<64x128xi32>
    %31 = arith.shrsi %29, %30 : vector<64x128xi32>
    %c65535_i32 = arith.constant 65535 : i32
    %32 = vector.broadcast %c65535_i32 : i32 to vector<64x128xi32>
    %33 = arith.andi %31, %32 : vector<64x128xi32>
    %34 = arith.xori %29, %33 : vector<64x128xi32>
    %c-2048144789_i32 = arith.constant -2048144789 : i32
    %35 = vector.broadcast %c-2048144789_i32 : i32 to vector<64x128xi32>
    %36 = arith.muli %34, %35 : vector<64x128xi32>
    %c13_i32 = arith.constant 13 : i32
    %37 = vector.broadcast %c13_i32 : i32 to vector<64x128xi32>
    %38 = arith.shrsi %36, %37 : vector<64x128xi32>
    %c524287_i32 = arith.constant 524287 : i32
    %39 = vector.broadcast %c524287_i32 : i32 to vector<64x128xi32>
    %40 = arith.andi %38, %39 : vector<64x128xi32>
    %41 = arith.xori %36, %40 : vector<64x128xi32>
    %c-1028477387_i32 = arith.constant -1028477387 : i32
    %42 = vector.broadcast %c-1028477387_i32 : i32 to vector<64x128xi32>
    %43 = arith.muli %41, %42 : vector<64x128xi32>
    %c16_i32_9 = arith.constant 16 : i32
    %44 = vector.broadcast %c16_i32_9 : i32 to vector<64x128xi32>
    %45 = arith.shrsi %43, %44 : vector<64x128xi32>
    %c65535_i32_10 = arith.constant 65535 : i32
    %46 = vector.broadcast %c65535_i32_10 : i32 to vector<64x128xi32>
    %47 = arith.andi %45, %46 : vector<64x128xi32>
    %48 = arith.xori %43, %47 : vector<64x128xi32>
    %c2147483647_i32 = arith.constant 2147483647 : i32
    %49 = vector.broadcast %c2147483647_i32 : i32 to vector<64x128xi32>
    %50 = arith.andi %48, %49 : vector<64x128xi32>
    %c214748364_i32 = arith.constant 214748364 : i32
    %51 = vector.broadcast %c214748364_i32 : i32 to vector<64x128xi32>
    %52 = arith.cmpi sge, %50, %51 : vector<64x128xi32>
    %cst_11 = arith.constant 0.000000e+00 : f32
    %53 = vector.broadcast %cst_11 : f32 to vector<64x128xf32>
    %54 = arith.select %52, %15, %53 : vector<64x128xi1>, vector<64x128xf32>
    %55 = arith.truncf %54 : vector<64x128xf32> to vector<64x128xbf16>
    %c0_12 = arith.constant 0 : index
    %c0_13 = arith.constant 0 : index
    %56 = vector.load %arg7[%c0_12, %c0_13] : memref<128x128xbf16, #tpu.memory_space<vmem>>, vector<128x128xbf16>
    %cst_14 = arith.constant dense<0.000000e+00> : vector<64x128xf32>
    %57 = tpu.matmul %55, %56, %cst_14 {dimension_numbers = #tpu.dot_dimension_numbers<[1], [0], [0], [1], [0, 0, 1, 1], [], []>} : vector<64x128xbf16>, vector<128x128xbf16>, vector<64x128xf32> -> vector<64x128xf32>
    %c0_15 = arith.constant 0 : index
    %c0_16 = arith.constant 0 : index
    %58 = vector.load %arg8[%c0_15, %c0_16] : memref<1x128xf32, #tpu.memory_space<vmem>>, vector<1x128xf32>
    %59 = vector.broadcast %58 : vector<1x128xf32> to vector<64x128xf32>
    %60 = arith.addf %57, %59 : vector<64x128xf32>
    %cst_17 = arith.constant 0.000000e+00 : f32
    %61 = vector.broadcast %cst_17 : f32 to vector<64x128xf32>
    %62 = arith.cmpf ogt, %60, %61 : vector<64x128xf32>
    %63 = vector.broadcast %1 : f32 to vector<64x128xf32>
    %64 = arith.mulf %63, %60 : vector<64x128xf32>
    %65 = arith.select %62, %60, %64 : vector<64x128xi1>, vector<64x128xf32>
    %66 = tpu.iota {dimensions = array<i32: 0>} : vector<64x128xi32>
    %67 = vector.broadcast %4 : i32 to vector<64x128xi32>
    %68 = arith.addi %66, %67 : vector<64x128xi32>
    %69 = tpu.iota {dimensions = array<i32: 1>} : vector<64x128xi32>
    %c128_i32_18 = arith.constant 128 : i32
    %70 = vector.broadcast %c128_i32_18 : i32 to vector<64x128xi32>
    %71 = arith.muli %68, %70 : vector<64x128xi32>
    %72 = arith.addi %71, %69 : vector<64x128xi32>
    %c-1640531527_i32_19 = arith.constant -1640531527 : i32
    %73 = vector.broadcast %c-1640531527_i32_19 : i32 to vector<64x128xi32>
    %74 = arith.muli %72, %73 : vector<64x128xi32>
    %c1013904223_i32_20 = arith.constant 1013904223 : i32
    %75 = arith.muli %0, %c1013904223_i32_20 : i32
    %76 = vector.broadcast %75 : i32 to vector<64x128xi32>
    %77 = arith.addi %74, %76 : vector<64x128xi32>
    %c749522786_i32 = arith.constant 749522786 : i32
    %78 = vector.broadcast %c749522786_i32 : i32 to vector<64x128xi32>
    %79 = arith.addi %77, %78 : vector<64x128xi32>
    %c16_i32_21 = arith.constant 16 : i32
    %80 = vector.broadcast %c16_i32_21 : i32 to vector<64x128xi32>
    %81 = arith.shrsi %79, %80 : vector<64x128xi32>
    %c65535_i32_22 = arith.constant 65535 : i32
    %82 = vector.broadcast %c65535_i32_22 : i32 to vector<64x128xi32>
    %83 = arith.andi %81, %82 : vector<64x128xi32>
    %84 = arith.xori %79, %83 : vector<64x128xi32>
    %c-2048144789_i32_23 = arith.constant -2048144789 : i32
    %85 = vector.broadcast %c-2048144789_i32_23 : i32 to vector<64x128xi32>
    %86 = arith.muli %84, %85 : vector<64x128xi32>
    %c13_i32_24 = arith.constant 13 : i32
    %87 = vector.broadcast %c13_i32_24 : i32 to vector<64x128xi32>
    %88 = arith.shrsi %86, %87 : vector<64x128xi32>
    %c524287_i32_25 = arith.constant 524287 : i32
    %89 = vector.broadcast %c524287_i32_25 : i32 to vector<64x128xi32>
    %90 = arith.andi %88, %89 : vector<64x128xi32>
    %91 = arith.xori %86, %90 : vector<64x128xi32>
    %c-1028477387_i32_26 = arith.constant -1028477387 : i32
    %92 = vector.broadcast %c-1028477387_i32_26 : i32 to vector<64x128xi32>
    %93 = arith.muli %91, %92 : vector<64x128xi32>
    %c16_i32_27 = arith.constant 16 : i32
    %94 = vector.broadcast %c16_i32_27 : i32 to vector<64x128xi32>
    %95 = arith.shrsi %93, %94 : vector<64x128xi32>
    %c65535_i32_28 = arith.constant 65535 : i32
    %96 = vector.broadcast %c65535_i32_28 : i32 to vector<64x128xi32>
    %97 = arith.andi %95, %96 : vector<64x128xi32>
    %98 = arith.xori %93, %97 : vector<64x128xi32>
    %c2147483647_i32_29 = arith.constant 2147483647 : i32
    %99 = vector.broadcast %c2147483647_i32_29 : i32 to vector<64x128xi32>
    %100 = arith.andi %98, %99 : vector<64x128xi32>
    %c214748364_i32_30 = arith.constant 214748364 : i32
    %101 = vector.broadcast %c214748364_i32_30 : i32 to vector<64x128xi32>
    %102 = arith.cmpi sge, %100, %101 : vector<64x128xi32>
    %cst_31 = arith.constant 0.000000e+00 : f32
    %103 = vector.broadcast %cst_31 : f32 to vector<64x128xf32>
    %104 = arith.select %102, %65, %103 : vector<64x128xi1>, vector<64x128xf32>
    %c0_32 = arith.constant 0 : index
    %c0_33 = arith.constant 0 : index
    %105 = vector.load %arg9[%c0_32, %c0_33] : memref<1x128xbf16, #tpu.memory_space<vmem>>, vector<1x128xbf16>
    %106 = arith.truncf %104 : vector<64x128xf32> to vector<64x128xbf16>
    %cst_34 = arith.constant dense<0.000000e+00> : vector<1x64xf32>
    %107 = tpu.matmul %105, %106, %cst_34 {dimension_numbers = #tpu.dot_dimension_numbers<[1], [1], [0], [0], [0, 0, 1, 0], [], []>} : vector<1x128xbf16>, vector<64x128xbf16>, vector<1x64xf32> -> vector<1x64xf32>
    %108 = vector.broadcast %3 : f32 to vector<1x64xf32>
    %109 = arith.addf %107, %108 : vector<1x64xf32>
    %cst_35 = arith.constant 0.000000e+00 : f32
    %110 = vector.broadcast %cst_35 : f32 to vector<1x64xf32>
    %111 = arith.cmpf ogt, %109, %110 : vector<1x64xf32>
    %112 = vector.broadcast %2 : f32 to vector<1x64xf32>
    %113 = arith.mulf %112, %109 : vector<1x64xf32>
    %114 = arith.select %111, %109, %113 : vector<1x64xi1>, vector<1x64xf32>
    %c0_36 = arith.constant 0 : index
    %c0_37 = arith.constant 0 : index
    %115 = vector.load %arg10[%c0_36, %c0_37] : memref<1x64xf32, #tpu.memory_space<vmem>>, vector<1x64xf32>
    tpu.vector_store %arg10[%c0_36, %c0_37], %114 {strides = array<i32>} : memref<1x64xf32, #tpu.memory_space<vmem>>, vector<1x64xf32>,
    return
  }
  func.func @transform_0(%arg0: i32) -> i32 {
    %c0_i32 = arith.constant 0 : i32
    %c0_i32_0 = arith.constant 0 : i32
    return %c0_i32 : i32
  }
  func.func @transform_1(%arg0: i32) -> i32 {
    %c0_i32 = arith.constant 0 : i32
    %c0_i32_0 = arith.constant 0 : i32
    return %c0_i32 : i32
  }
  func.func @transform_2(%arg0: i32) -> i32 {
    %c0_i32 = arith.constant 0 : i32
    %c0_i32_0 = arith.constant 0 : i32
    return %c0_i32 : i32
  }
  func.func @transform_3(%arg0: i32) -> (i32, i32) {
    %c0_i32 = arith.constant 0 : i32
    %c0_i32_0 = arith.constant 0 : i32
    return %arg0, %c0_i32 : i32, i32
  }
  func.func @transform_4(%arg0: i32) -> (i32, i32) {
    %c0_i32 = arith.constant 0 : i32
    %c0_i32_0 = arith.constant 0 : i32
    %c0_i32_1 = arith.constant 0 : i32
    return %c0_i32, %c0_i32_0 : i32, i32
  }
  func.func @transform_5(%arg0: i32) -> (i32, i32) {
    %c0_i32 = arith.constant 0 : i32
    %c0_i32_0 = arith.constant 0 : i32
    %c0_i32_1 = arith.constant 0 : i32
    return %c0_i32, %c0_i32_0 : i32, i32
  }
  func.func @transform_6(%arg0: i32) -> (i32, i32) {
    %c0_i32 = arith.constant 0 : i32
    %c0_i32_0 = arith.constant 0 : i32
    %c0_i32_1 = arith.constant 0 : i32
    return %c0_i32, %c0_i32_0 : i32, i32
  }
  func.func @transform_7(%arg0: i32) -> (i32, i32) {
    %c0_i32 = arith.constant 0 : i32
    %c0_i32_0 = arith.constant 0 : i32
    %c0_i32_1 = arith.constant 0 : i32
    return %c0_i32, %c0_i32_0 : i32, i32
  }
  func.func @transform_8(%arg0: i32) -> (i32, i32) {
    %c0_i32 = arith.constant 0 : i32
    %c0_i32_0 = arith.constant 0 : i32
    %c0_i32_1 = arith.constant 0 : i32
    return %c0_i32, %c0_i32_0 : i32, i32
  }
  func.func @transform_9(%arg0: i32) -> (i32, i32) {
    %c0_i32 = arith.constant 0 : i32
    %c0_i32_0 = arith.constant 0 : i32
    return %c0_i32, %arg0 : i32, i32
  }
}

</mosaic_0001>

<bundles_post_ra>
// kernel: tpu_custom_call.1
= control target key start
LH: loop header
LB: loop body
LE: loop exit
PB: predicated region body
PF: predicated region fallthrough
CT: control target
= control target key end

     0   :  { %16 = vsyncpa [#allocation7], 0  ;;  %s1457_s0 = inlined_call_operand.<no memory space> [shape: s32[1], index: 0, kind: input, shape index: {}]   ;;  %s1458_s1 = inlined_call_operand.vmem [shape: f32[2], index: 1, kind: input, shape index: {}]   ;;  %s1459_s2 = inlined_call_operand.<no memory space> [shape: f32[1], index: 2, kind: input, shape index: {}]   ;;  %s1460_s3 = inlined_call_operand.hbm [shape: bf16[64,156], index: 3, kind: input, shape index: {}]   ;;  %s1461_s4 = inlined_call_operand.hbm [shape: bf16[156,128], index: 4, kind: input, shape index: {}]   ;;  %s1462_s5 = inlined_call_operand.vmem [shape: f32[1,128], index: 5, kind: input, shape index: {}]   ;;  %s1463_s6 = inlined_call_operand.hbm [shape: bf16[128,128], index: 6, kind: input, shape index: {}]   ;;  %s1464_s7 = inlined_call_operand.vmem [shape: f32[1,128], index: 7, kind: input, shape index: {}]   ;;  %s1465_s8 = inlined_call_operand.vmem [shape: bf16[1,128], index: 8, kind: input, shape index: {}]   ;;  %s1466_s9 = inlined_call_operand.hbm [shape: f32[1,64], index: 9, kind: output, shape index: {}]  }
   0x1   :  { %17 = vsyncpa [#allocation5], 0 }
   0x2   :  { %18 = vsyncpa [#allocation10], 0 }
   0x3   :  { %19 = vsyncpa [#allocation6], 0  ;;  %s1167_s30 = smov [#allocation9]   ;;  %s28_s13 = sshll.u32 %s1458_s1, 4  ;;  %s29_s13 = int_to_ptr.vmem [resolvable:$true] %s28_s13 }
   0x4   :  { %s51_s10 = sshll.u32 %s1167_s30, 4  ;;  %s1059_s16 = scalar_lea.hbm %s1461_s4, 1280  ;;  %s52_s10 = int_to_ptr.vmem [resolvable:$true] %s51_s10 }
   0x5   :  { %p1060_p0 = scmp.ne.s32.totalorder %s1461_s4, %s1059_s16  ;;  %p1063_p1 = scmp.lt.u32.totalorder %s1059_s16, %s1461_s4 }
   0x7   :  { %p1065_p2 = pnand %p1063_p1, %p1060_p0 }
   0x9   :  { %1068 = shalt.err (!%p1065_p2)
}
   0xa   :  { %s1069_s21 = scalar_lea.vmem %s52_s10, 1280  ;;  %p1074_p4 = scmp.lt.s32.totalorder %s52_s10, %s52_s10 }
   0xb   :  { %p1070_p3 = scmp.ne.s32.totalorder %s52_s10, %s1069_s21  ;;  %p1075_p5 = scmp.lt.s32.totalorder %s1069_s21, %s1069_s21 }
   0xd   :  { %p1076_p6 = por %p1075_p5, %p1074_p4 }
   0xf   :  { %p1077_p7 = pnand %p1076_p6, %p1070_p3 }
  0x11   :  { %1080 = shalt.err (!%p1077_p7)
}
  0x12   :  { %s1168_s1 = smov 64   ;;  %s1169_s22 = smov 4  }
  0x13   :  { %57 = dma.hbm_to_vmem [thread:$0]  %s1461_s4, 1280, %s52_s10, [#allocation10], %s1168_s1, %s1168_s1, %s1169_s22  }
  0x14   :  { %s1081_s25 = scalar_lea.vmem %s29_s13, 16  ;;  %p1086_p9 = scmp.lt.s32.totalorder %s29_s13, %s29_s13 }
  0x15   :  { %p1082_p8 = scmp.ne.s32.totalorder %s29_s13, %s1081_s25  ;;  %p1087_p10 = scmp.lt.s32.totalorder %s1081_s25, %s1081_s25 }
  0x17   :  { %p1088_p11 = por %p1087_p10, %p1086_p9 }
  0x19   :  { %p1089_p12 = pnand %p1088_p11, %p1082_p8 }
  0x1b   :  { %1092 = shalt.err (!%p1089_p12)
}
  0x1c   :  { %s1170_s26 = smov [#allocation4]   ;;  %s1171_s27 = smov [#allocation8]  }
  0x1d   :  { %31 = dma.vmem_to_smem %s29_s13, 16, %s1170_s26, [#allocation7]  }
  0x1e   :  { %s39_s28 = sshll.u32 %s1171_s27, 4  ;;  %s1093_s11 = scalar_lea.hbm %s1460_s3, 1024  ;;  %s40_s28 = int_to_ptr.vmem [resolvable:$true] %s39_s28 }
  0x1f   :  { %p1094_p13 = scmp.ne.s32.totalorder %s1460_s3, %s1093_s11  ;;  %p1097_p0 = scmp.lt.u32.totalorder %s1093_s11, %s1460_s3 }
  0x21   :  { %p1099_p1 = pnand %p1097_p0, %p1094_p13 }
  0x23   :  { %1102 = shalt.err (!%p1099_p1)
}
  0x24   :  { %s1103_s15 = scalar_lea.vmem %s40_s28, 1024  ;;  %p1108_p3 = scmp.lt.s32.totalorder %s40_s28, %s40_s28 }
  0x25   :  { %p1104_p2 = scmp.ne.s32.totalorder %s40_s28, %s1103_s15  ;;  %p1109_p4 = scmp.lt.s32.totalorder %s1103_s15, %s1103_s15 }
  0x27   :  { %p1110_p5 = por %p1109_p4, %p1108_p3 }
  0x29   :  { %p1111_p6 = pnand %p1110_p5, %p1104_p2 }
  0x2b   :  { %1114 = shalt.err (!%p1111_p6)
}
  0x2c   :  { %s1172_s13 = smov 128   ;;  %s1173_s16 = smov 8  }
  0x2d   :  { %45 = dma.hbm_to_vmem [thread:$0]  %s1460_s3, 1024, %s40_s28, [#allocation5], %s1172_s13, %s1172_s13, %s1173_s16  }
  0x2e   :  { %s1174_s19 = smov [#allocation11]   ;;  %s1115_s24 = scalar_lea.hbm %s1463_s6, 1024 }
  0x2f   :  { %s65_s20 = sshll.u32 %s1174_s19, 4  ;;  %p1116_p7 = scmp.ne.s32.totalorder %s1463_s6, %s1115_s24  ;;  %s66_s20 = int_to_ptr.vmem [resolvable:$true] %s65_s20 }
  0x30   :  { %p1119_p8 = scmp.lt.u32.totalorder %s1115_s24, %s1463_s6 }
  0x32   :  { %p1121_p9 = pnand %p1119_p8, %p1116_p7 }
  0x34   :  { %1124 = shalt.err (!%p1121_p9)
}
  0x35   :  { %s1125_s30 = scalar_lea.vmem %s66_s20, 1024  ;;  %p1130_p11 = scmp.lt.s32.totalorder %s66_s20, %s66_s20 }
  0x36   :  { %p1126_p10 = scmp.ne.s32.totalorder %s66_s20, %s1125_s30  ;;  %p1131_p12 = scmp.lt.s32.totalorder %s1125_s30, %s1125_s30 }
  0x38   :  { %p1132_p13 = por %p1131_p12, %p1130_p11 }
  0x3a   :  { %p1133_p0 = pnand %p1132_p13, %p1126_p10 }
  0x3c   :  { %1136 = shalt.err (!%p1133_p0)
}
  0x3d   :  { %71 = dma.hbm_to_vmem [thread:$0]  %s1463_s6, 1024, %s66_s20, [#allocation10], %s1168_s1, %s1168_s1, %s1169_s22  }
  0x3e   :  { %1159 = dma.done.wait [#allocation7], 16  }
  0x3f   :  { %1160 = vsyncadd [#allocation7], 4294967280 }
  0x40   :  { %1161 = dma.done.wait [#allocation5], 1024  }
  0x41   :  { %1162 = vsyncadd [#allocation5], 4294966272 }
  0x42   :  { %1163 = dma.done.wait [#allocation10], 2304  }
  0x43   :  { %1164 = vsyncadd [#allocation10], 4294964992 }
  0x44   :  { %88 = sfence }
  0x45   :  { %v1029_v0 = vld [vmem:[#allocation9] sm:$0xff]   ;;  %v1175_v1 = vmov 0   ;;  %v1030_v2 = vld [vmem:[#allocation9 + $0x8] sm:$0xff]   ;;  %v1031_v3 = vld [vmem:[#allocation9 + $0x10] sm:$0xff]   ;;  %vm225_vm0 = vcmask 228352   ;;  %vm238_vm1 = vcmask 1045504   ;;  %v332_v28 = vlaneseq }
  0x46   :  { %242 = vmatprep.subr.bf16.mxu0 %v1175_v1  ;;  %v1032_v4 = vld [vmem:[#allocation9 + $0x18] sm:$0xff]   ;;  %v1041_v5 = vld [vmem:[#allocation8 + $0x4] ss:$8 sps:$4 sm:$0xff]   ;;  %v1051_v7 = vld [vmem:[#allocation11] sm:$0xff]   ;;  %s376_s22 = smul.u32 1013904223, %s1457_s0 }
  0x47   :  { %243 = vmatpush1.bf16.msra.mxu0 %v1029_v0  ;;  %879 = vmatprep.mubr.msk.bf16.mxu0 %vm225_vm0, %v1041_v5  ;;  %v1033_v6 = vld [vmem:[#allocation9 + $0x20] sm:$0xff]   ;;  %v1052_v8 = vld [vmem:[#allocation11 + $0x8] sm:$0xff]   ;;  %v1034_v9 = vld [vmem:[#allocation9 + $0x28] sm:$0xff]   ;;  %v333_v29 = vshrl.u32 %v332_v28, 7  ;;  %v351_v31 = vand.u32 127, %v332_v28  ;;  %s91_s0 = sld [smem:[#allocation4]] }
  0x48   :  { %244 = vmatprep.subr.bf16.mxu0 %v1175_v1  ;;  %981 = vmatprep.subr.bf16.mxu1 %v1051_v7  ;;  %v1053_v10 = vld [vmem:[#allocation11 + $0x10] sm:$0xff]   ;;  %v1035_v11 = vld [vmem:[#allocation9 + $0x30] sm:$0xff]   ;;  %v1054_v12 = vld [vmem:[#allocation11 + $0x18] sm:$0xff]   ;;  %v377_v40 = vstv %s376_s22  ;;  %s859_s10 = sld [smem:[#allocation4 + $0x1]]  ;;  %s1178_s16 = smov [#allocation12]  }
  0x49   :  { %982 = vmatpush3.bf16.msra.mxu1 %v1051_v7  ;;  %v1036_v13 = vld [vmem:[#allocation9 + $0x38] sm:$0xff]   ;;  %v1037_v14 = vld [vmem:[#allocation9 + $0x40] sm:$0xff]   ;;  %v1038_v15 = vld [vmem:[#allocation9 + $0x48] sm:$0x3f]   ;;  %v334_v30 = vadd.s32 8, %v333_v29  ;;  %v352_v32 = vmul.u32 128, %v333_v29 }
  0x4a   :  { %983 = vmatprep.subr.bf16.mxu1 %v1052_v8  ;;  %v240_v16 = vsel %vm238_vm1, %v1038_v15, 0  ;;  %v1039_v17 = vld [vmem:[#allocation8] ss:$8 sps:$4 sm:$0xff]   ;;  %v1042_v18 = vld [vmem:[#allocation8 + $0x14] ss:$8 sps:$4 sm:$0xff]   ;;  %v335_v36 = vadd.s32 16, %v333_v29 }
  0x4b   :  { %245 = vmatpush1.bf16.msra.mxu0 %v1030_v2  ;;  %v1044_v19 = vld [vmem:[#allocation8 + $0x10] ss:$8 sps:$4 sm:$0xff]   ;;  %v1045_v20 = vld [vmem:[#allocation8 + $0x24] ss:$8 sps:$4 sm:$0xff]   ;;  %v1047_v21 = vld [vmem:[#allocation8 + $0x20] ss:$8 sps:$4 sm:$0xff]   ;;  %v360_v34 = vadd.s32 %v352_v32, %v351_v31 }
  0x4c   :  { %246 = vmatprep.subr.bf16.mxu0 %v1175_v1  ;;  %v1048_v22 = vld [vmem:[#allocation8 + $0x34] ss:$8 sps:$4 sm:$0xff]   ;;  %v1050_v23 = vld [vmem:[#allocation8 + $0x30] ss:$8 sps:$4 sm:$0xff]   ;;  %v1057_v26 = vld [vmem:[#allocation11 + $0x30] sm:$0xff]   ;;  %v353_v33 = vmul.u32 128, %v334_v30 }
  0x4d   :  { %984 = vmatpush3.bf16.msra.mxu1 %v1052_v8  ;;  %v1055_v24 = vld [vmem:[#allocation11 + $0x20] sm:$0xff]   ;;  %v1056_v25 = vld [vmem:[#allocation11 + $0x28] sm:$0xff]   ;;  %v1058_v27 = vld [vmem:[#allocation11 + $0x38] sm:$0xff]   ;;  %v336_v37 = vadd.s32 24, %v333_v29  ;;  %v368_v38 = vmul.u32 2654435769, %v360_v34 }
  0x4e   :  { %985 = vmatprep.subr.bf16.mxu1 %v1053_v10  ;;  %v361_v35 = vadd.s32 %v353_v33, %v351_v31  ;;  %v354_v41 = vmul.u32 128, %v335_v36  ;;  %v337_v47 = vadd.s32 32, %v333_v29  ;;  %v338_v48 = vadd.s32 40, %v333_v29  ;;  %s848_s17 = sshll.u32 %s1178_s16, 4  ;;  %s849_s17 = int_to_ptr.vmem [resolvable:$true] %s848_s17 }
  0x4f   :  { %247 = vmatpush1.bf16.msra.mxu0 %v1031_v3  ;;  %v355_v42 = vmul.u32 128, %v336_v37  ;;  %v1281_v43 = vadd.s32 %v377_v40, %v368_v38  ;;  %v339_v61 = vadd.s32 48, %v333_v29  ;;  %v340_v62 = vadd.s32 56, %v333_v29  ;;  %s1141_s18 = scalar_lea.vmem %s849_s17, 32  ;;  %p1142_p2 = scmp.lt.s32.totalorder %s849_s17, %s849_s17 }
  0x50   :  { %248 = vmatprep.subr.bf16.mxu0 %v1175_v1  ;;  %v369_v39 = vmul.u32 2654435769, %v361_v35  ;;  %v362_v45 = vadd.s32 %v354_v41, %v351_v31  ;;  %v356_v53 = vmul.u32 128, %v337_v47 }
  0x51   :  { %986 = vmatpush3.bf16.msra.mxu1 %v1053_v10  ;;  %v363_v46 = vadd.s32 %v355_v42, %v351_v31  ;;  %v386_v49 = vadd.s32 374761393, %v1281_v43  ;;  %v357_v54 = vmul.u32 128, %v338_v48  ;;  %v358_v5 = vmul.u32 128, %v339_v61 }
  0x52   :  { %987 = vmatprep.subr.bf16.mxu1 %v1054_v12  ;;  %v1283_v44 = vadd.s32 %v377_v40, %v369_v39  ;;  %v370_v51 = vmul.u32 2654435769, %v362_v45  ;;  %v364_v59 = vadd.s32 %v356_v53, %v351_v31 }
  0x53   :  { %249 = vmatpush1.bf16.msra.mxu0 %v1032_v4  ;;  %v371_v52 = vmul.u32 2654435769, %v363_v46  ;;  %v883_v55 = vshrl.u32 %v386_v49, 16  ;;  %v365_v60 = vadd.s32 %v357_v54, %v351_v31 }
  0x54   :  { %250 = vmatprep.subr.bf16.mxu0 %v1175_v1  ;;  %v387_v50 = vadd.s32 374761393, %v1283_v44  ;;  %v1287_v57 = vadd.s32 %v377_v40, %v370_v51  ;;  %v372_v3 = vmul.u32 2654435769, %v364_v59  ;;  %v1308_v59 = vld [vmem:[%s1462_s5] ss:$0 sm:$0xff] }
  0x55   :  { %988 = vmatpush3.bf16.msra.mxu1 %v1054_v12  ;;  %v1289_v58 = vadd.s32 %v377_v40, %v371_v52  ;;  %v410_v63 = vxor.u32 %v883_v55, %v386_v49  ;;  %v373_v4 = vmul.u32 2654435769, %v365_v60 }
  0x56   :  { %989 = vmatprep.subr.bf16.mxu1 %v1055_v24  ;;  %v884_v56 = vshrl.u32 %v387_v50, 16 }
  0x57   :  { %251 = vmatpush1.bf16.msra.mxu0 %v1033_v6  ;;  %v389_v2 = vadd.s32 374761393, %v1289_v58  ;;  %v359_v6 = vmul.u32 128, %v340_v62  ;;  %v418_v7 = vmul.u32 2246822507, %v410_v63  ;;  %v1295_v12 = vadd.s32 %v377_v40, %v373_v4 }
  0x58   :  { %252 = vmatprep.subr.bf16.mxu0 %v1175_v1  ;;  %v411_v0 = vxor.u32 %v884_v56, %v387_v50 }
  0x59   :  { %990 = vmatpush3.bf16.msra.mxu1 %v1055_v24  ;;  %v886_v10 = vshrl.u32 %v389_v2, 16  ;;  %v891_v15 = vshrl.u32 %v418_v7, 13 }
  0x5a   :  { %991 = vmatprep.subr.bf16.mxu1 %v1056_v25  ;;  %v419_v8 = vmul.u32 2246822507, %v411_v0 }
  0x5b   :  { %253 = vmatpush1.bf16.msra.mxu0 %v1034_v9 }
  0x5c   :  { %254 = vmatprep.subr.bf16.mxu0 %v1175_v1 }
  0x5d   :  { %992 = vmatpush3.bf16.msra.mxu1 %v1056_v25 }
  0x5e   :  { %993 = vmatprep.subr.bf16.mxu1 %v1057_v26 }
  0x5f   :  { %255 = vmatpush1.bf16.msra.mxu0 %v1035_v11  ;;  %v1293_v11 = vadd.s32 %v377_v40, %v372_v3 }
  0x60   :  { %256 = vmatprep.subr.bf16.mxu0 %v1175_v1 }
  0x61   :  { %994 = vmatpush3.bf16.msra.mxu1 %v1057_v26 }
  0x62   :  { %995 = vmatprep.subr.bf16.mxu1 %v1058_v27 }
  0x63   :  { %257 = vmatpush1.bf16.msra.mxu0 %v1036_v13  ;;  %v366_v13 = vadd.s32 %v358_v5, %v351_v31 }
  0x64   :  { %258 = vmatprep.subr.bf16.mxu0 %v1175_v1 }
  0x65   :  { %996 = vmatpush3.bf16.msra.mxu1 %v1058_v27 }
  0x67   :  { %259 = vmatpush1.bf16.msra.mxu0 %v1037_v14  ;;  %v367_v14 = vadd.s32 %v359_v6, %v351_v31 }
  0x68   :  { %260 = vmatprep.subr.bf16.mxu0 %v1175_v1  ;;  %v388_v1 = vadd.s32 374761393, %v1287_v57 }
  0x6a   :  { %v885_v9 = vshrl.u32 %v388_v1, 16 }
  0x6b   :  { %261 = vmatpush1.bf16.msra.mxu0 %v240_v16  ;;  %v892_v16 = vshrl.u32 %v419_v8, 13 }
  0x6d   :  { %v443_v24 = vxor.u32 %v892_v16, %v419_v8 }
  0x6e   :  { %275 = vmatmul.mubr.bf16.vlgmr.msra.gmra.mrb[0].mxu0 %v1039_v17  ;;  %v412_v17 = vxor.u32 %v885_v9, %v388_v1 }
  0x6f   :  { %880 = vmatprep.mubr.msk.bf16.mxu0 %vm225_vm0, %v1042_v18  ;;  %v413_v18 = vxor.u32 %v886_v10, %v389_v2  ;;  %v451_v32 = vmul.u32 3266489909, %v443_v24  ;;  %v1310_v2 = vstv %s91_s0 }
  0x70   :  { %v420_v25 = vmul.u32 2246822507, %v412_v17 }
  0x71   :  { %v421_v26 = vmul.u32 2246822507, %v413_v18  ;;  %v900_v41 = vshrl.u32 %v451_v32, 16 }
  0x72   :  { %v893_v33 = vshrl.u32 %v420_v25, 13 }
  0x73   :  { %v894_v34 = vshrl.u32 %v421_v26, 13  ;;  %v475_v50 = vxor.u32 %v900_v41, %v451_v32 }
  0x74   :  { %v444_v42 = vxor.u32 %v893_v33, %v420_v25 }
  0x75   :  { %v445_v45 = vxor.u32 %v894_v34, %v421_v26  ;;  %v483_v61 = vand.u32 2147483647, %v475_v50 }
  0x76   :  { %283 = vmatmul.mubr.bf16.gmra.mrb[4].mxu0 %v1044_v19  ;;  %v390_v19 = vadd.s32 374761393, %v1293_v11  ;;  %v452_v51 = vmul.u32 3266489909, %v444_v42 }
  0x77   :  { %881 = vmatprep.mubr.msk.bf16.mxu0 %vm225_vm0, %v1045_v20  ;;  %v391_v20 = vadd.s32 374761393, %v1295_v12  ;;  %v453_v52 = vmul.u32 3266489909, %v445_v45  ;;  %vm1317_vm3 = vcmp.ge.s32.totalorder %v483_v61, 214748364 }
  0x78   :  { %v887_v27 = vshrl.u32 %v390_v19, 16  ;;  %v901_v62 = vshrl.u32 %v452_v51, 16 }
  0x79   :  { %v888_v28 = vshrl.u32 %v391_v20, 16  ;;  %v902_v63 = vshrl.u32 %v453_v52, 16 }
  0x7a   :  { %v414_v35 = vxor.u32 %v887_v27, %v390_v19 }
  0x7b   :  { %v415_v36 = vxor.u32 %v888_v28, %v391_v20  ;;  %v477_v17 = vxor.u32 %v902_v63, %v453_v52 }
  0x7c   :  { %v422_v46 = vmul.u32 2246822507, %v414_v35 }
  0x7d   :  { %v423_v47 = vmul.u32 2246822507, %v415_v36  ;;  %v485_v26 = vand.u32 2147483647, %v477_v17 }
  0x7e   :  { %291 = vmatmul.mubr.bf16.gmra.mrb[8].mxu0 %v1047_v21  ;;  %v374_v21 = vmul.u32 2654435769, %v366_v13  ;;  %v895_v53 = vshrl.u32 %v422_v46, 13  ;;  %v476_v13 = vxor.u32 %v901_v62, %v452_v51 }
  0x7f   :  { %882 = vmatprep.mubr.msk.bf16.mxu0 %vm225_vm0, %v1048_v22  ;;  %v375_v22 = vmul.u32 2654435769, %v367_v14  ;;  %v896_v54 = vshrl.u32 %v423_v47, 13  ;;  %vm1335_vm8 = vcmp.ge.s32.totalorder %v485_v26, 214748364 }
  0x80   :  { %v1299_v29 = vadd.s32 %v377_v40, %v374_v21  ;;  %v446_v0 = vxor.u32 %v895_v53, %v422_v46 }
  0x81   :  { %v1301_v30 = vadd.s32 %v377_v40, %v375_v22  ;;  %v447_v3 = vxor.u32 %v896_v54, %v423_v47 }
  0x82   :  { %v392_v37 = vadd.s32 374761393, %v1299_v29  ;;  %v454_v18 = vmul.u32 3266489909, %v446_v0 }
  0x83   :  { %v393_v38 = vadd.s32 374761393, %v1301_v30  ;;  %v455_v19 = vmul.u32 3266489909, %v447_v3 }
  0x84   :  { %v889_v48 = vshrl.u32 %v392_v37, 16  ;;  %v903_v27 = vshrl.u32 %v454_v18, 16 }
  0x85   :  { %v890_v40 = vshrl.u32 %v393_v38, 16  ;;  %v904_v32 = vshrl.u32 %v455_v19, 16 }
  0x86   :  { %299 = vmatmul.mubr.bf16.gmra.mrb[12].mxu0 %v1050_v23  ;;  %v442_v23 = vxor.u32 %v891_v15, %v418_v7  ;;  %v416_v55 = vxor.u32 %v889_v48, %v392_v37  ;;  %v478_v46 = vxor.u32 %v903_v27, %v454_v18  ;;  %v670_v27 = vadd.s32 749522786, %v1281_v43 }
  0x87   :  { %v417_v56 = vxor.u32 %v890_v40, %v393_v38  ;;  %v479_v47 = vxor.u32 %v904_v32, %v455_v19 }
  0x88   :  { %v450_v31 = vmul.u32 3266489909, %v442_v23  ;;  %v424_v4 = vmul.u32 2246822507, %v416_v55  ;;  %v484_v23 = vand.u32 2147483647, %v476_v13 }
  0x89   :  { %v425_v5 = vmul.u32 2246822507, %v417_v56  ;;  %v486_v52 = vand.u32 2147483647, %v478_v46  ;;  %v487_v55 = vand.u32 2147483647, %v479_v47 }
  0x8a   :  { %v899_v39 = vshrl.u32 %v450_v31, 16  ;;  %v897_v20 = vshrl.u32 %v424_v4, 13  ;;  %vm1329_vm7 = vcmp.ge.s32.totalorder %v484_v23, 214748364 }
  0x8b   :  { %v898_v21 = vshrl.u32 %v425_v5, 13  ;;  %vm919_vm11 = vmpackc.low %vm1335_vm8, %vm1329_vm7  ;;  %vm1347_vm12 = vcmp.ge.s32.totalorder %v486_v52, 214748364  ;;  %vm1351_vm14 = vcmp.ge.s32.totalorder %v487_v55, 214748364 }
  0x8c   :  { %v474_v49 = vxor.u32 %v899_v39, %v450_v31  ;;  %v448_v33 = vxor.u32 %v897_v20, %v424_v4  ;;  %vm922_vm0 = vmpackc.low %vm1351_vm14, %vm1347_vm12  ;;  %v673_v52 = vadd.s32 749522786, %v1289_v58  ;;  %v677_v58 = vadd.s32 749522786, %v1301_v30 }
  0x8d   :  { %v449_v34 = vxor.u32 %v898_v21, %v425_v5 }
  0x8e   :  { %v482_v60 = vand.u32 2147483647, %v474_v49  ;;  %v456_v48 = vmul.u32 3266489909, %v448_v33 }
  0x8f   :  { %v457_v40 = vmul.u32 3266489909, %v449_v34 }
  0x90   :  { %vm1313_vm2 = vcmp.ge.s32.totalorder %v482_v60, 214748364  ;;  %v905_v56 = vshrl.u32 %v456_v48, 16 }
  0x91   :  { %vm916_vm6 = vmpackc.low %vm1317_vm3, %vm1313_vm2  ;;  %v906_v60 = vshrl.u32 %v457_v40, 16 }
 0x141   :  { %v276_v1 = vpop.f32.mrb[0].mxu0 }
 0x142   :  { %v277_v6 = vadd.f32 %v1308_v59, %v276_v1  ;;  %v278_v7 = vpop.f32.mrb[1].mxu0 }
 0x143   :  { %v279_v8 = vpop.f32.mrb[2].mxu0  ;;  %v481_v7 = vxor.u32 %v906_v60, %v457_v40  ;;  %v674_v60 = vadd.s32 749522786, %v1293_v11  ;;  %v935_v11 = vshrl.u32 %v677_v58, 16 }
 0x144   :  { %v316_v14 = vmul.f32 %v1310_v2, %v277_v6  ;;  %v280_v15 = vadd.f32 %v1308_v59, %v279_v8  ;;  %v281_v16 = vpop.f32.mrb[3].mxu0  ;;  %vm307_vm4 = vcmp.gt.f32.partialorder %v277_v6, 0.0 }
 0x145   :  { %v489_v16 = vand.u32 2147483647, %v481_v7 }
 0x146   :  { %v317_v22 = vmul.f32 %v1310_v2, %v280_v15  ;;  %vm308_vm5 = vcmp.gt.f32.partialorder %v280_v15, 0.0  ;;  %v324_v24 = vsel %vm307_vm4, %v277_v6, %v316_v14  ;;  %v480_v6 = vxor.u32 %v905_v56, %v456_v48 }
 0x147   :  { %vm497_vm3 = vcmp.ge.s32.totalorder %v489_v16, 214748364 }
 0x148   :  { %v325_v25 = vsel %vm308_vm5, %v280_v15, %v317_v22  ;;  %v488_v15 = vand.u32 2147483647, %v480_v6 }
 0x149   :  { %v284_v28 = vpop.f32.mrb[4].mxu0  ;;  %v917_v31 = vpack.c.bf16 %v325_v25, %v324_v24 }
 0x14a   :  { %v285_v35 = vadd.f32 %v1308_v59, %v284_v28  ;;  %v286_v36 = vpop.f32.mrb[5].mxu0  ;;  %vm496_vm2 = vcmp.ge.s32.totalorder %v488_v15, 214748364  ;;  %v671_v28 = vadd.s32 749522786, %v1283_v44 }
 0x14b   :  { %v287_v37 = vpop.f32.mrb[6].mxu0  ;;  %997 = vmatprep.mubr.msk.bf16.mxu1 %vm916_vm6, %v917_v31  ;;  %vm925_vm5 = vmpackc.low %vm497_vm3, %vm496_vm2  ;;  %v928_v31 = vshrl.u32 %v670_v27, 16 }
 0x14c   :  { %v318_v39 = vmul.f32 %v1310_v2, %v285_v35  ;;  %v288_v41 = vadd.f32 %v1308_v59, %v287_v37  ;;  %v289_v42 = vpop.f32.mrb[7].mxu0  ;;  %vm309_vm9 = vcmp.gt.f32.partialorder %v285_v35, 0.0  ;;  %v929_v32 = vshrl.u32 %v671_v28, 16 }
 0x14d   :  { %v694_v33 = vxor.u32 %v928_v31, %v670_v27 }
 0x14e   :  { %vm310_vm10 = vcmp.gt.f32.partialorder %v288_v41, 0.0  ;;  %v319_v49 = vmul.f32 %v1310_v2, %v288_v41  ;;  %v326_v50 = vsel %vm309_vm9, %v285_v35, %v318_v39  ;;  %vm1177_vm9 = vmmov 0  }
 0x14f   :  { %v702_v34 = vmul.u32 2246822507, %v694_v33 }
 0x150   :  { %v327_v51 = vsel %vm310_vm10, %v288_v41, %v319_v49 }
 0x151   :  { %v920_v53 = vpack.c.bf16 %v327_v51, %v326_v50  ;;  %v292_v54 = vpop.f32.mrb[8].mxu0  ;;  %v936_v36 = vshrl.u32 %v702_v34, 13  ;;  %v1176_v50 = vmov 0.0   ;;  %v672_v51 = vadd.s32 749522786, %v1287_v57 }
 0x152   :  { %v293_v61 = vadd.f32 %v1308_v59, %v292_v54  ;;  %v294_v62 = vpop.f32.mrb[9].mxu0  ;;  %1005 = vmatprep.subr.bf16.mxu1 %v1176_v50  ;;  %v931_v54 = vshrl.u32 %v673_v52, 16  ;;  %v676_v57 = vadd.s32 749522786, %v1299_v29 }
 0x153   :  { %v295_v63 = vpop.f32.mrb[10].mxu0  ;;  %998 = vmatmul.mubr.msk.bf16.vlgmr.msra.gmra.mrb[0].mxu1 %vm919_vm11, %v920_v53  ;;  %v726_v38 = vxor.u32 %v936_v36, %v702_v34  ;;  %v930_v53 = vshrl.u32 %v672_v51, 16 }
 0x154   :  { %v320_v0 = vmul.f32 %v1310_v2, %v293_v61  ;;  %v296_v1 = vadd.f32 %v1308_v59, %v295_v63  ;;  %v297_v3 = vpop.f32.mrb[11].mxu0  ;;  %vm311_vm13 = vcmp.gt.f32.partialorder %v293_v61, 0.0  ;;  %v697_v56 = vxor.u32 %v931_v54, %v673_v52 }
 0x155   :  { %v734_v41 = vmul.u32 3266489909, %v726_v38  ;;  %v696_v55 = vxor.u32 %v930_v53, %v672_v51 }
 0x156   :  { %vm312_vm15 = vcmp.gt.f32.partialorder %v296_v1, 0.0  ;;  %v321_v8 = vmul.f32 %v1310_v2, %v296_v1  ;;  %v328_v9 = vsel %vm311_vm13, %v293_v61, %v320_v0  ;;  %v675_v61 = vadd.s32 749522786, %v1295_v12 }
 0x157   :  { %v944_v45 = vshrl.u32 %v734_v41, 16  ;;  %v704_v62 = vmul.u32 2246822507, %v696_v55  ;;  %v705_v63 = vmul.u32 2246822507, %v697_v56  ;;  %v932_v0 = vshrl.u32 %v674_v60, 16 }
 0x158   :  { %v329_v10 = vsel %vm312_vm15, %v296_v1, %v321_v8  ;;  %v933_v1 = vshrl.u32 %v675_v61, 16 }
 0x159   :  { %v923_v13 = vpack.c.bf16 %v329_v10, %v328_v9  ;;  %v300_v14 = vpop.f32.mrb[12].mxu0  ;;  %v758_v47 = vxor.u32 %v944_v45, %v734_v41  ;;  %v938_v3 = vshrl.u32 %v704_v62, 13  ;;  %v939_v4 = vshrl.u32 %v705_v63, 13 }
 0x15a   :  { %v301_v17 = vadd.f32 %v1308_v59, %v300_v14  ;;  %v302_v18 = vpop.f32.mrb[13].mxu0  ;;  %v698_v5 = vxor.u32 %v932_v0, %v674_v60  ;;  %v699_v6 = vxor.u32 %v933_v1, %v675_v61 }
 0x15b   :  { %v303_v19 = vpop.f32.mrb[14].mxu0  ;;  %1001 = vmatprep.mubr.msk.bf16.mxu1 %vm922_vm0, %v923_v13  ;;  %v766_v40 = vand.u32 2147483647, %v758_v47  ;;  %v728_v7 = vxor.u32 %v938_v3, %v704_v62  ;;  %v729_v8 = vxor.u32 %v939_v4, %v705_v63  ;;  %v934_v13 = vshrl.u32 %v676_v57, 16 }
 0x15c   :  { %v322_v20 = vmul.f32 %v1310_v2, %v301_v17  ;;  %v304_v21 = vadd.f32 %v1308_v59, %v303_v19  ;;  %v305_v22 = vpop.f32.mrb[15].mxu0  ;;  %vm313_vm1 = vcmp.gt.f32.partialorder %v301_v17, 0.0  ;;  %v695_v59 = vxor.u32 %v929_v32, %v671_v28  ;;  %v1389_v19 = vld [vmem:[%s1464_s7] ss:$0 sm:$0xff] }
 0x15d   :  { %vm1366_vm6 = vcmp.ge.s32.totalorder %v766_v40, 214748364  ;;  %v706_v9 = vmul.u32 2246822507, %v698_v5  ;;  %v707_v10 = vmul.u32 2246822507, %v699_v6  ;;  %v701_v18 = vxor.u32 %v935_v11, %v677_v58 }
 0x15e   :  { %vm314_vm4 = vcmp.gt.f32.partialorder %v304_v21, 0.0  ;;  %v323_v23 = vmul.f32 %v1310_v2, %v304_v21  ;;  %v330_v24 = vsel %vm313_vm1, %v301_v17, %v322_v20  ;;  %v703_v35 = vmul.u32 2246822507, %v695_v59 }
 0x15f   :  { %v736_v14 = vmul.u32 3266489909, %v728_v7  ;;  %v737_v12 = vmul.u32 3266489909, %v729_v8  ;;  %v940_v15 = vshrl.u32 %v706_v9, 13  ;;  %v941_v16 = vshrl.u32 %v707_v10, 13 }
 0x160   :  { %v331_v25 = vsel %vm314_vm4, %v304_v21, %v323_v23  ;;  %v937_v37 = vshrl.u32 %v703_v35, 13  ;;  %v700_v17 = vxor.u32 %v934_v13, %v676_v57 }
 0x161   :  { %v926_v26 = vpack.c.bf16 %v331_v25, %v330_v24  ;;  %v946_v29 = vshrl.u32 %v736_v14, 16  ;;  %v947_v20 = vshrl.u32 %v737_v12, 16  ;;  %v730_v30 = vxor.u32 %v940_v15, %v706_v9 }
 0x162   :  { %v727_v39 = vxor.u32 %v937_v37, %v703_v35  ;;  %v731_v21 = vxor.u32 %v941_v16, %v707_v10  ;;  %v708_v23 = vmul.u32 2246822507, %v700_v17 }
 0x163   :  { %1002 = vmatmul.mubr.msk.bf16.gmra.mrb[4].mxu1 %vm925_vm5, %v926_v26  ;;  %v709_v26 = vmul.u32 2246822507, %v701_v18  ;;  %v760_v31 = vxor.u32 %v946_v29, %v736_v14  ;;  %v761_v32 = vxor.u32 %v947_v20, %v737_v12  ;;  %v738_v35 = vmul.u32 3266489909, %v730_v30 }
 0x164   :  { %v735_v42 = vmul.u32 3266489909, %v727_v39  ;;  %1013 = vmatprep.mubr.msk.bf16.mxu1 %vm1177_vm9, %v1176_v50  ;;  %v739_v36 = vmul.u32 3266489909, %v731_v21  ;;  %v942_v39 = vshrl.u32 %v708_v23, 13 }
 0x165   :  { %v768_v55 = vand.u32 2147483647, %v760_v31  ;;  %v769_v56 = vand.u32 2147483647, %v761_v32 }
 0x166   :  { %v945_v46 = vshrl.u32 %v735_v42, 16  ;;  %v949_v40 = vshrl.u32 %v739_v36, 16  ;;  %v732_v53 = vxor.u32 %v942_v39, %v708_v23 }
 0x167   :  { %vm1405_vm14 = vcmp.ge.s32.totalorder %v768_v55, 214748364  ;;  %vm1409_vm15 = vcmp.ge.s32.totalorder %v769_v56, 214748364 }
 0x168   :  { %v759_v48 = vxor.u32 %v945_v46, %v735_v42  ;;  %v943_v42 = vshrl.u32 %v709_v26, 13  ;;  %v763_v62 = vxor.u32 %v949_v40, %v739_v36  ;;  %v740_v63 = vmul.u32 3266489909, %v732_v53  ;;  %vm955_vm0 = vmpackc.low %vm1409_vm15, %vm1405_vm14 }
 0x16a   :  { %v767_v43 = vand.u32 2147483647, %v759_v48  ;;  %v948_v48 = vshrl.u32 %v738_v35, 16  ;;  %v733_v60 = vxor.u32 %v943_v42, %v709_v26  ;;  %v771_v49 = vand.u32 2147483647, %v763_v62 }
 0x16b   :  { %v950_v44 = vshrl.u32 %v740_v63, 16  ;;  %v795_v26 = vstv %s1459_s2 }
 0x16c   :  { %vm1370_vm7 = vcmp.ge.s32.totalorder %v767_v43, 214748364  ;;  %v762_v61 = vxor.u32 %v948_v48, %v738_v35  ;;  %v741_v3 = vmul.u32 3266489909, %v733_v60  ;;  %vm1425_vm2 = vcmp.ge.s32.totalorder %v771_v49, 214748364 }
 0x16d   :  { %vm952_vm8 = vmpackc.low %vm1370_vm7, %vm1366_vm6  ;;  %v764_v16 = vxor.u32 %v950_v44, %v740_v63 }
 0x16e   :  { %v770_v4 = vand.u32 2147483647, %v762_v61  ;;  %v951_v58 = vshrl.u32 %v741_v3, 16 }
 0x170   :  { %vm1421_vm1 = vcmp.ge.s32.totalorder %v770_v4, 214748364  ;;  %v765_v18 = vxor.u32 %v951_v58, %v741_v3 }
 0x171   :  { %vm958_vm7 = vmpackc.low %vm1425_vm2, %vm1421_vm1 }
 0x226   :  { %v999_v22 = vpop.f32.mrb[0].mxu1 }
 0x227   :  { %v624_v24 = vadd.f32 %v999_v22, %v1389_v19  ;;  %v615_v25 = vpop.f32.mrb[1].mxu1 }
 0x228   :  { %v616_v27 = vadd.f32 %v1389_v19, %v615_v25  ;;  %v1000_v28 = vpop.f32.mrb[2].mxu1  ;;  %v773_v25 = vand.u32 2147483647, %v765_v18 }
 0x229   :  { %v656_v33 = vmul.f32 %v624_v24, %v1310_v2  ;;  %v627_v59 = vadd.f32 %v1000_v28, %v1389_v19  ;;  %v618_v34 = vpop.f32.mrb[3].mxu1  ;;  %vm648_vm10 = vcmp.gt.f32.partialorder %v624_v24, 0.0  ;;  %v837_v28 = vstv %s859_s10 }
 0x22a   :  { %v654_v37 = vmul.f32 %v616_v27, %v1310_v2  ;;  %v619_v38 = vadd.f32 %v1389_v19, %v618_v34  ;;  %vm646_vm11 = vcmp.gt.f32.partialorder %v616_v27, 0.0  ;;  %vm781_vm9 = vcmp.ge.s32.totalorder %v773_v25, 214748364 }
 0x22b   :  { %vm649_vm12 = vcmp.gt.f32.partialorder %v627_v59, 0.0  ;;  %v657_v41 = vmul.f32 %v627_v59, %v1310_v2  ;;  %v664_v46 = vsel %vm648_vm10, %v624_v24, %v656_v33  ;;  %v772_v24 = vand.u32 2147483647, %v764_v16 }
 0x22c   :  { %vm647_vm13 = vcmp.gt.f32.partialorder %v619_v38, 0.0  ;;  %v655_v45 = vmul.f32 %v619_v38, %v1310_v2  ;;  %v662_v43 = vsel %vm646_vm11, %v616_v27, %v654_v37 }
 0x22d   :  { %v665_v47 = vsel %vm649_vm12, %v627_v59, %v657_v41  ;;  %vm840_vm12 = vcmask 516096  }
 0x22e   :  { %v956_v51 = vpack.c.bf16 %v665_v47, %v664_v46  ;;  %v663_v52 = vsel %vm647_vm13, %v619_v38, %v655_v45 }
 0x22f   :  { %v953_v54 = vpack.c.bf16 %v663_v52, %v662_v43 }
 0x231   :  { %1006 = vmatpush3.bf16.xpose.msk.msra.mxu1 %vm952_vm8, %v953_v54  ;;  %vm780_vm8 = vcmp.ge.s32.totalorder %v772_v24, 214748364 }
 0x232   :  { %1007 = vmatprep.subr.bf16.mxu1 %v1176_v50  ;;  %vm961_vm10 = vmpackc.low %vm781_vm9, %vm780_vm8 }
 0x236   :  { %v1003_v5 = vpop.f32.mrb[4].mxu1 }
 0x237   :  { %v640_v6 = vadd.f32 %v1003_v5, %v1389_v19  ;;  %v631_v57 = vpop.f32.mrb[5].mxu1 }
 0x238   :  { %v632_v7 = vadd.f32 %v1389_v19, %v631_v57  ;;  %v1004_v8 = vpop.f32.mrb[6].mxu1 }
 0x239   :  { %v660_v9 = vmul.f32 %v640_v6, %v1310_v2  ;;  %v643_v10 = vadd.f32 %v1004_v8, %v1389_v19  ;;  %v634_v13 = vpop.f32.mrb[7].mxu1  ;;  %1008 = vmatpush3.bf16.xpose.msk.msra.mxu1 %vm955_vm0, %v956_v51  ;;  %vm652_vm3 = vcmp.gt.f32.partialorder %v640_v6, 0.0 }
 0x23a   :  { %v658_v12 = vmul.f32 %v632_v7, %v1310_v2  ;;  %v635_v15 = vadd.f32 %v1389_v19, %v634_v13  ;;  %1009 = vmatprep.subr.bf16.mxu1 %v1176_v50  ;;  %vm650_vm4 = vcmp.gt.f32.partialorder %v632_v7, 0.0 }
 0x23b   :  { %vm653_vm5 = vcmp.gt.f32.partialorder %v643_v10, 0.0  ;;  %v661_v17 = vmul.f32 %v643_v10, %v1310_v2  ;;  %v668_v20 = vsel %vm652_vm3, %v640_v6, %v660_v9 }
 0x23c   :  { %vm651_vm6 = vcmp.gt.f32.partialorder %v635_v15, 0.0  ;;  %v659_v29 = vmul.f32 %v635_v15, %v1310_v2  ;;  %v666_v21 = vsel %vm650_vm4, %v632_v7, %v658_v12  ;;  %v790_v2 = vld [vmem:[%s1465_s8] sm:$0x1]  ;;  %s1137_s8 = scalar_lea.vmem %s849_s17, 16 }
 0x23d   :  { %v669_v30 = vsel %vm653_vm5, %v643_v10, %v661_v17  ;;  %p1138_p1 = scmp.ne.s32.totalorder %s849_s17, %s1137_s8  ;;  %p1143_p3 = scmp.lt.s32.totalorder %s1141_s18, %s1137_s8 }
 0x23e   :  { %v962_v22 = vpack.c.bf16 %v669_v30, %v668_v20  ;;  %v667_v23 = vsel %vm651_vm6, %v635_v15, %v659_v29 }
 0x23f   :  { %v959_v19 = vpack.c.bf16 %v667_v23, %v666_v21  ;;  %p1144_p4 = por %p1143_p3, %p1142_p2 }
 0x241   :  { %1010 = vmatpush3.bf16.xpose.msk.msra.mxu1 %vm958_vm7, %v959_v19  ;;  %p1145_p5 = pnand %p1144_p4, %p1138_p1 }
 0x242   :  { %1011 = vmatprep.subr.bf16.mxu1 %v1176_v50 }
 0x249   :  { %1012 = vmatpush3.bf16.xpose.msk.msra.mxu1 %vm961_vm10, %v962_v22 }
 0x250   :  { %1014 = vmatmul.mubr.bf16.vlgmr.msra.gmra.mrb[8].mxu1 %v790_v2 }
 0x323   :  { %v830_v27 = vpop.f32.mrb[8].mxu1 }
 0x324   :  { %v831_v31 = vadd.f32 %v830_v27, %v795_v26  ;;  %v1015_v32 = vpop.f32.mrb[9].mxu1 }
 0x325   :  { %v833_v50 = vpop.f32.mrb[10].mxu1 }
 0x326   :  { %v838_v33 = vmul.f32 %v837_v28, %v831_v31  ;;  %v1016_v59 = vpop.f32.mrb[11].mxu1  ;;  %vm836_vm11 = vcmp.gt.f32.partialorder %v831_v31, 0.0 }
 0x328   :  { %v839_v34 = vsel %vm836_vm11, %v831_v31, %v838_v33 }
 0x329   :  { %841 = vst.msk [vmem:[#allocation12] sm:$0x1] %vm840_vm12, %v839_v34 }
 0x32a   :  { %1148 = shalt.err (!%p1145_p5)
}
 0x32b   :  { %s1149_s20 = scalar_lea.hbm %s1466_s9, 16 }
 0x32c   :  { %p1150_p6 = scmp.ne.s32.totalorder %s1466_s9, %s1149_s20  ;;  %p1153_p7 = scmp.lt.u32.totalorder %s1149_s20, %s1466_s9 }
 0x32e   :  { %p1155_p8 = pnand %p1153_p7, %p1150_p6 }
 0x330   :  { %1158 = shalt.err (!%p1155_p8)
}
 0x331   :  { %851 = dma.vmem_to_hbm [thread:$0]  %s849_s17, 16, %s1466_s9, [#allocation6]  }
 0x332   :  { %1165 = dma.done.wait [#allocation6], 16  }
 0x333   :  { %1166 = vsyncadd [#allocation6], 4294967280 }
 0x334   :  { %855 = vsyncpa [#allocation5], 1 }
 0x335   :  { %856 = vsyncpa [#allocation10], 1 }
 0x336   :  { %857 = vsyncpa [#allocation6], 1 }
 0x337   :  { %858 = vsyncpa [#allocation7], 1 }

</bundles_post_ra>
